<compile_context>
chip_gen: v5e
topology: v5e:2x2
jax: 0.10.0
libtpu: 0.0.40
codegen_flags: <defaults>
</compile_context>

<pallas_src>
import math

import jax
import jax.numpy as jnp
from jax.experimental import pallas as pl
from jax.experimental.pallas import tpu as pltpu

_MIB = 1024 * 1024
_TM_CANDIDATES = (2048, 1024, 512, 256, 128, 64, 32, 16, 8)  # MXU prefers >=256


# ---------------------------------------------------------------------------
# Kernels
# ---------------------------------------------------------------------------
def _query_kernel_resident(x_ref, w_ref, b_ref, o_ref):
    """Whole (K, N) weight resident in VMEM; one M tile per grid step.

    x_ref: (TM, K) bf16   w_ref: (K, N) bf16   b_ref: (1, N) f32   o_ref: (TM, N)
    """
    acc = jnp.dot(x_ref[...], w_ref[...], preferred_element_type=jnp.float32)
    o_ref[...] = (acc + b_ref[...]).astype(o_ref.dtype)


def _query_kernel_tiled(x_ref, w_ref, b_ref, o_ref, acc_ref):
    """K-reduction grid axis (last, 'arbitrary') with an f32 VMEM accumulator.

    x_ref: (TM, TK)   w_ref: (TK, TN)   b_ref: (1, TN)   o_ref: (TM, TN)
    """
    @pl.when(pl.program_id(2) == 0)
    def _():
        acc_ref[...] = jnp.zeros_like(acc_ref)

    acc_ref[...] += jnp.dot(x_ref[...], w_ref[...],
                            preferred_element_type=jnp.float32)

    @pl.when(pl.program_id(2) == pl.num_programs(2) - 1)
    def _():
        o_ref[...] = (acc_ref[...] + b_ref[...]).astype(o_ref.dtype)


# ---------------------------------------------------------------------------
# Tiling / VMEM budgeting helpers
# ---------------------------------------------------------------------------
def _round_up(v, m):
    return ((v + m - 1) // m) * m


def _vmem_capacity_bytes():
    """Physical per-TensorCore VMEM, queried from the runtime when possible."""
    try:
        info = pltpu.get_tpu_info()
        cap = getattr(info, "vmem_capacity_bytes", None)
        if cap:
            return int(cap)
    except Exception:
        pass
    return 64 * _MIB  # conservative fallback (v7x per-core VMEM)


def _vmem_budget_bytes(capacity):
    """Usable scratch budget: ~3/4 of physical with >=16 MiB headroom.
    ~96 MiB on v5e/v6e (128 MiB physical), ~48 MiB on v7x (64 MiB per core)."""
    return max(16 * _MIB, min(capacity - 16 * _MIB, (capacity * 3) // 4))


def _choose_tm_resident(M, K, N, xb, ob, budget, resident_bytes):
    per_row = 2 * (K * xb + N * ob)  # double-buffered x + out rows
    tm = 8
    for cand in _TM_CANDIDATES:
        if resident_bytes + cand * per_row <= budget:
            tm = cand
            break
    tm = min(tm, _round_up(M, 8))
    return max(8, _round_up(tm, 8))


def _choose_k_block(K, max_tk=512):
    """Largest multiple-of-128 divisor of K up to max_tk.  The contraction axis
    must never be ragged (OOB garbage would feed the accumulator), so only
    exact divisors are allowed; returns None if K has no such divisor."""
    best = None
    t = 128
    while t <= min(K, max_tk):
        if K % t == 0:
            best = t
        t += 128
    return best


def _choose_n_block(N):
    if N % 128 == 0:
        return min(N, 256)
    if N > 128:
        return 128  # ragged last N block: OOB output columns are masked on store
    return N        # N < 128: single lane-masked block (equals full dim)


def _choose_tm_tiled(M, TK, TN, xb, ob, budget):
    fixed = 2 * (TK * TN * 2 + TN * 4)             # weight + bias tiles (2 bufs)
    per_row = 2 * (TK * xb + TN * ob) + TN * 4     # x/out tiles (2 bufs) + f32 acc
    tm = 8
    for cand in _TM_CANDIDATES:
        if fixed + cand * per_row <= budget:
            tm = cand
            break
    tm = min(tm, _round_up(M, 8))
    return max(8, _round_up(tm, 8))


# ---------------------------------------------------------------------------
# Wrapper
# ---------------------------------------------------------------------------
def query_forward(x, weight, bias, *, force_kn_tiling=False):
    """x: (..., K); weight: (N, K) (PyTorch nn.Linear layout); bias: (N,).

    Returns x @ weight.T + bias with shape (..., N), in x.dtype.
    """
    *lead, K = x.shape
    N = weight.shape[0]
    M = 1
    for d in lead:
        M *= d
    out_dtype = x.dtype

    # bf16 operands for the MXU; one-time (K, N) weight layout so the kernel
    # never has to transpose the RHS per grid step.
    x2d = x.reshape(M, K).astype(jnp.bfloat16)
    w_t = weight.T.astype(jnp.bfloat16)          # (K, N)
    b2d = bias.astype(jnp.float32).reshape(1, N)

    xb, wb = 2, 2                                # bf16 bytes
    ob = jnp.dtype(out_dtype).itemsize

    capacity = _vmem_capacity_bytes()
    budget = _vmem_budget_bytes(capacity)

    cost = pl.CostEstimate(
        flops=2 * M * K * N,
        transcendentals=0,
        bytes_accessed=M * K * xb + K * N * wb + N * 4 + M * N * ob,
    )

    # Size the resident weight at 2 buffers in case pl.Buffered(1) is not honored.
    resident_bytes = 2 * (K * N * wb + N * 4)
    use_resident = (not force_kn_tiling) and (resident_bytes <= budget // 2)

    TM = None
    if use_resident:
        TM = _choose_tm_resident(M, K, N, xb, ob, budget, resident_bytes)
        # If VMEM pressure forced TM below an MXU-friendly size, prefer tiling K
        # instead of starving the matmul's M dimension.
        if TM < 128 and M >= 128 and _choose_k_block(K) is not None:
            use_resident = False

    if use_resident:
        footprint = resident_bytes + 2 * TM * (K * xb + N * ob)
        vmem_limit = int(min(capacity - 8 * _MIB,
                             max(32 * _MIB, footprint + 8 * _MIB)))

        def build(single_buffer_resident):
            if single_buffer_resident:
                res_kw = dict(pipeline_mode=pl.Buffered(1))  # constant blocks: 1 buf
            else:
                res_kw = {}
            return pl.pallas_call(
                _query_kernel_resident,
                out_shape=jax.ShapeDtypeStruct((M, N), out_dtype),
                grid_spec=pltpu.PrefetchScalarGridSpec(
                    num_scalar_prefetch=0,
                    grid=(pl.cdiv(M, TM),),
                    in_specs=[
                        pl.BlockSpec((TM, K), lambda i: (i, 0)),          # x: streamed
                        pl.BlockSpec((K, N), lambda i: (0, 0), **res_kw),  # weight: resident
                        pl.BlockSpec((1, N), lambda i: (0, 0), **res_kw),  # bias: resident
                    ],
                    out_specs=pl.BlockSpec((TM, N), lambda i: (i, 0)),
                ),
                compiler_params=pltpu.CompilerParams(
                    dimension_semantics=("parallel",),  # megacore shard on v7x
                    vmem_limit_bytes=vmem_limit,
                ),
                cost_estimate=cost,
            )

        try:
            out2d = build(True)(x2d, w_t, b2d)
        except Exception:
            # pl.Buffered(1) (or the pipeline_mode kwarg) unsupported on this
            # jax version -> fall back to default double buffering.
            out2d = build(False)(x2d, w_t, b2d)
    else:
        TK = _choose_k_block(K) or K
        TN = _choose_n_block(N)
        TM = _choose_tm_tiled(M, TK, TN, xb, ob, budget)
        footprint = (2 * (TM * TK * xb + TK * TN * wb + TN * 4 + TM * TN * ob)
                     + TM * TN * 4)
        vmem_limit = int(min(capacity - 8 * _MIB,
                             max(32 * _MIB, footprint + 8 * _MIB)))

        out2d = pl.pallas_call(
            _query_kernel_tiled,
            out_shape=jax.ShapeDtypeStruct((M, N), out_dtype),
            grid_spec=pltpu.PrefetchScalarGridSpec(
                num_scalar_prefetch=0,
                grid=(pl.cdiv(M, TM), pl.cdiv(N, TN), pl.cdiv(K, TK)),
                in_specs=[
                    pl.BlockSpec((TM, TK), lambda i, j, k: (i, k)),
                    pl.BlockSpec((TK, TN), lambda i, j, k: (k, j)),
                    pl.BlockSpec((1, TN), lambda i, j, k: (0, j)),
                ],
                out_specs=pl.BlockSpec((TM, TN), lambda i, j, k: (i, j)),
                scratch_shapes=[pltpu.VMEM((TM, TN), jnp.float32)],
            ),
            compiler_params=pltpu.CompilerParams(
                dimension_semantics=("parallel", "parallel", "arbitrary"),
                vmem_limit_bytes=vmem_limit,
            ),
            cost_estimate=cost,
        )(x2d, w_t, b2d)

    return out2d.reshape(*lead, N)


def init_query_params(key, dim_input, dim_attn, dtype=jnp.float32):
    """Deterministic init mimicking torch.nn.Linear defaults
    (uniform in [-1/sqrt(fan_in), 1/sqrt(fan_in)]); PyTorch (N, K) layout."""
    kw, kb = jax.random.split(key)
    bound = 1.0 / math.sqrt(dim_input)
    weight = jax.random.uniform(kw, (dim_attn, dim_input), dtype,
                                minval=-bound, maxval=bound)
    bias = jax.random.uniform(kb, (dim_attn,), dtype,
                              minval=-bound, maxval=bound)
    return weight, bias


if __name__ == "__main__":
    key = jax.random.PRNGKey(0)
    k_x, k_p, k_x2, k_p2 = jax.random.split(key, 4)

    # Main case (resident-weight fast path), shapes implied by the module.
    batch, seq, dim_input, dim_attn = 2, 8, 32, 16
    x = jax.random.normal(k_x, (batch, seq, dim_input), dtype=jnp.float32)
    weight, bias = init_query_params(k_p, dim_input, dim_attn)

    out = query_forward(x, weight, bias)
    out = jax.block_until_ready(out)
    ref = x @ weight.T + bias
    assert out.shape == (batch, seq, dim_attn), out.shape
    assert jnp.allclose(out, ref, atol=3e-2, rtol=3e-2), float(
        jnp.max(jnp.abs(out - ref)))

    # Exercise the K/N-tiled fallback path (used when the weight would not fit
    # the VMEM budget) on a small shape by forcing it.
    di2, da2 = 1024, 128
    x2 = jax.random.normal(k_x2, (batch, seq, di2), dtype=jnp.float32)
    w2, b2 = init_query_params(k_p2, di2, da2)
    out2 = query_forward(x2, w2, b2, force_kn_tiling=True)
    out2 = jax.block_until_ready(out2)
    ref2 = x2 @ w2.T + b2
    assert out2.shape == (batch, seq, da2), out2.shape
    assert jnp.allclose(out2, ref2, atol=5e-2, rtol=5e-2), float(
        jnp.max(jnp.abs(out2 - ref2)))

    print("KERNEL_OK")
</pallas_src>

<mosaic_0001>
module attributes {stable_mosaic.version = 11 : i64} {
  func.func @_query_kernel_resident(%arg0: i32, %arg1: memref<16x32xbf16, #tpu.memory_space<vmem>>, %arg2: memref<32x16xbf16, #tpu.memory_space<vmem>>, %arg3: memref<1x16xf32, #tpu.memory_space<vmem>>, %arg4: memref<16x16xf32, #tpu.memory_space<vmem>>) attributes {dimension_semantics = [#tpu.dimension_semantics<parallel>], iteration_bounds = array<i64: 1>, scalar_prefetch = 0 : i64, scratch_operands = 0 : i64, tpu.core_type = #tpu.core_type<tc>, window_params = [{transform_indices = @transform_0, window_bounds = array<i64: 16, 32>}, {pipeline_mode = #tpu.pipeline_mode<synchronous>, transform_indices = @transform_1, window_bounds = array<i64: 32, 16>}, {pipeline_mode = #tpu.pipeline_mode<synchronous>, transform_indices = @transform_2, window_bounds = array<i64: 1, 16>}, {transform_indices = @transform_3, window_bounds = array<i64: 16, 16>}]} {
    %c0 = arith.constant 0 : index
    %c0_0 = arith.constant 0 : index
    %0 = vector.load %arg1[%c0, %c0_0] : memref<16x32xbf16, #tpu.memory_space<vmem>>, vector<16x32xbf16>
    %c0_1 = arith.constant 0 : index
    %c0_2 = arith.constant 0 : index
    %1 = vector.load %arg2[%c0_1, %c0_2] : memref<32x16xbf16, #tpu.memory_space<vmem>>, vector<32x16xbf16>
    %cst = arith.constant dense<0.000000e+00> : vector<16x16xf32>
    %2 = tpu.matmul %0, %1, %cst {dimension_numbers = #tpu.dot_dimension_numbers<[1], [0], [0], [1], [0, 0, 1, 1], [], []>} : vector<16x32xbf16>, vector<32x16xbf16>, vector<16x16xf32> -> vector<16x16xf32>
    %c0_3 = arith.constant 0 : index
    %c0_4 = arith.constant 0 : index
    %3 = vector.load %arg3[%c0_3, %c0_4] : memref<1x16xf32, #tpu.memory_space<vmem>>, vector<1x16xf32>
    %4 = vector.broadcast %3 : vector<1x16xf32> to vector<16x16xf32>
    %5 = arith.addf %2, %4 : vector<16x16xf32>
    %c0_5 = arith.constant 0 : index
    %c0_6 = arith.constant 0 : index
    %6 = vector.load %arg4[%c0_5, %c0_6] : memref<16x16xf32, #tpu.memory_space<vmem>>, vector<16x16xf32>
    tpu.vector_store %arg4[%c0_5, %c0_6], %5 {strides = array<i32>} : memref<16x16xf32, #tpu.memory_space<vmem>>, vector<16x16xf32>,
    return
  }
  func.func @transform_0(%arg0: i32) -> (i32, i32) {
    %c0_i32 = arith.constant 0 : i32
    %c0_i32_0 = arith.constant 0 : i32
    return %arg0, %c0_i32 : i32, i32
  }
  func.func @transform_1(%arg0: i32) -> (i32, i32) {
    %c0_i32 = arith.constant 0 : i32
    %c0_i32_0 = arith.constant 0 : i32
    %c0_i32_1 = arith.constant 0 : i32
    return %c0_i32, %c0_i32_0 : i32, i32
  }
  func.func @transform_2(%arg0: i32) -> (i32, i32) {
    %c0_i32 = arith.constant 0 : i32
    %c0_i32_0 = arith.constant 0 : i32
    %c0_i32_1 = arith.constant 0 : i32
    return %c0_i32, %c0_i32_0 : i32, i32
  }
  func.func @transform_3(%arg0: i32) -> (i32, i32) {
    %c0_i32 = arith.constant 0 : i32
    %c0_i32_0 = arith.constant 0 : i32
    return %arg0, %c0_i32 : i32, i32
  }
}

module attributes {stable_mosaic.version = 11 : i64} {
  func.func @_query_kernel_resident(%arg0: i32, %arg1: memref<16x32xbf16, #tpu.memory_space<vmem>>, %arg2: memref<32x16xbf16, #tpu.memory_space<vmem>>, %arg3: memref<1x16xf32, #tpu.memory_space<vmem>>, %arg4: memref<16x16xf32, #tpu.memory_space<vmem>>) attributes {dimension_semantics = [#tpu.dimension_semantics<parallel>], iteration_bounds = array<i64: 1>, scalar_prefetch = 0 : i64, scratch_operands = 0 : i64, tpu.core_type = #tpu.core_type<tc>, window_params = [{transform_indices = @transform_0, window_bounds = array<i64: 16, 32>}, {pipeline_mode = #tpu.pipeline_mode<synchronous>, transform_indices = @transform_1, window_bounds = array<i64: 32, 16>}, {pipeline_mode = #tpu.pipeline_mode<synchronous>, transform_indices = @transform_2, window_bounds = array<i64: 1, 16>}, {transform_indices = @transform_3, window_bounds = array<i64: 16, 16>}]} {
    %c0 = arith.constant 0 : index
    %c0_0 = arith.constant 0 : index
    %0 = vector.load %arg1[%c0, %c0_0] : memref<16x32xbf16, #tpu.memory_space<vmem>>, vector<16x32xbf16>
    %c0_1 = arith.constant 0 : index
    %c0_2 = arith.constant 0 : index
    %1 = vector.load %arg2[%c0_1, %c0_2] : memref<32x16xbf16, #tpu.memory_space<vmem>>, vector<32x16xbf16>
    %cst = arith.constant dense<0.000000e+00> : vector<16x16xf32>
    %2 = tpu.matmul %0, %1, %cst {dimension_numbers = #tpu.dot_dimension_numbers<[1], [0], [0], [1], [0, 0, 1, 1], [], []>} : vector<16x32xbf16>, vector<32x16xbf16>, vector<16x16xf32> -> vector<16x16xf32>
    %c0_3 = arith.constant 0 : index
    %c0_4 = arith.constant 0 : index
    %3 = vector.load %arg3[%c0_3, %c0_4] : memref<1x16xf32, #tpu.memory_space<vmem>>, vector<1x16xf32>
    %4 = vector.broadcast %3 : vector<1x16xf32> to vector<16x16xf32>
    %5 = arith.addf %2, %4 : vector<16x16xf32>
    %c0_5 = arith.constant 0 : index
    %c0_6 = arith.constant 0 : index
    %6 = vector.load %arg4[%c0_5, %c0_6] : memref<16x16xf32, #tpu.memory_space<vmem>>, vector<16x16xf32>
    tpu.vector_store %arg4[%c0_5, %c0_6], %5 {strides = array<i32>} : memref<16x16xf32, #tpu.memory_space<vmem>>, vector<16x16xf32>,
    return
  }
  func.func @transform_0(%arg0: i32) -> (i32, i32) {
    %c0_i32 = arith.constant 0 : i32
    %c0_i32_0 = arith.constant 0 : i32
    return %arg0, %c0_i32 : i32, i32
  }
  func.func @transform_1(%arg0: i32) -> (i32, i32) {
    %c0_i32 = arith.constant 0 : i32
    %c0_i32_0 = arith.constant 0 : i32
    %c0_i32_1 = arith.constant 0 : i32
    return %c0_i32, %c0_i32_0 : i32, i32
  }
  func.func @transform_2(%arg0: i32) -> (i32, i32) {
    %c0_i32 = arith.constant 0 : i32
    %c0_i32_0 = arith.constant 0 : i32
    %c0_i32_1 = arith.constant 0 : i32
    return %c0_i32, %c0_i32_0 : i32, i32
  }
  func.func @transform_3(%arg0: i32) -> (i32, i32) {
    %c0_i32 = arith.constant 0 : i32
    %c0_i32_0 = arith.constant 0 : i32
    return %arg0, %c0_i32 : i32, i32
  }
}

</mosaic_0001>

<bundles_post_ra>
// kernel: tpu_custom_call.1
= control target key start
LH: loop header
LB: loop body
LE: loop exit
PB: predicated region body
PF: predicated region fallthrough
CT: control target
= control target key end

     0   :  { %s166_s0 = inlined_call_operand.vmem [shape: bf16[16,32], index: 0, kind: input, shape index: {}]   ;;  %s167_s1 = inlined_call_operand.vmem [shape: bf16[32,16], index: 1, kind: input, shape index: {}]   ;;  %s168_s2 = inlined_call_operand.vmem [shape: f32[1,16], index: 2, kind: input, shape index: {}]   ;;  %s169_s3 = inlined_call_operand.hbm [shape: f32[16,16], index: 3, kind: output, shape index: {}]  }
   0x1   :  { %v97_v0 = vld [vmem:[%s167_s1 + $0x8] sm:$0xff] }
   0x2   :  { %8 = vsyncpa [#allocation3], 0  ;;  %53 = vmatpush.bf16.msra.mxu0 %v97_v0  ;;  %v96_v1 = vld [vmem:[%s167_s1] sm:$0xff]  ;;  %vm43_vm0 = vcmask 261120   ;;  %vm61_vm1 = vcmask 130048   ;;  %s128_s20 = smov [#allocation2]  }
   0x3   :  { %v95_v2 = vld [vmem:[%s166_s0] sm:$0xff]  ;;  %s68_s21 = sshll.u32 %s128_s20, 4  ;;  %s70_s1 = sshll.u32 %s169_s3, 4  ;;  %s69_s21 = int_to_ptr.vmem [resolvable:$true] %s68_s21  ;;  %s71_s1 = int_to_ptr.hbm [resolvable:$true] %s70_s1 }
   0x4   :  { %v101_v3 = vld [vmem:[%s168_s2] ss:$0 sm:$0xff]  ;;  %s129_s0 = smov 128   ;;  %s130_s24 = smov 8  }
   0x6   :  { %54 = vmatpush.bf16.msra.mxu0 %v96_v1 }
   0x9   :  { %94 = vmatmul.msk.bf16.vlgmr.msra.gmra.mxu0 %vm43_vm0, %v95_v2 }
  0x86   :  { %v56_v4 = vpop.f32.mrf.mxu0 }
  0x87   :  { %v57_v5 = vadd.f32 %v101_v3, %v56_v4 }
  0x89   :  { %62 = vst.msk [vmem:[#allocation2] sm:$0xff] %vm61_vm1, %v57_v5 }
  0x8e   :  { %v58_v6 = vpop.f32.mrf.mxu0 }
  0x8f   :  { %v59_v7 = vadd.f32 %v101_v3, %v58_v6 }
  0x91   :  { %63 = vst.msk [vmem:[#allocation2 + $0x8] sm:$0xff] %vm61_vm1, %v59_v7 }
  0x92   :  { %76 = dma.vmem_to_hbm [thread:$0]  %s69_s21, 256, %s71_s1, [#allocation3], %s129_s0, %s129_s0, %s130_s24  }
  0x93   :  { %126 = dma.done.wait [#allocation3], 256  }
  0x94   :  { %127 = vsyncadd [#allocation3], 4294967040 }
  0x95   :  { %81 = vsyncpa [#allocation3], 1 }

// kernel: tpu_custom_call.1
= control target key start
LH: loop header
LB: loop body
LE: loop exit
PB: predicated region body
PF: predicated region fallthrough
CT: control target
= control target key end

     0   :  { %s166_s0 = inlined_call_operand.vmem [shape: bf16[16,32], index: 0, kind: input, shape index: {}]   ;;  %s167_s1 = inlined_call_operand.vmem [shape: bf16[32,16], index: 1, kind: input, shape index: {}]   ;;  %s168_s2 = inlined_call_operand.vmem [shape: f32[1,16], index: 2, kind: input, shape index: {}]   ;;  %s169_s3 = inlined_call_operand.hbm [shape: f32[16,16], index: 3, kind: output, shape index: {}]  }
   0x1   :  { %v97_v0 = vld [vmem:[%s167_s1 + $0x8] sm:$0xff] }
   0x2   :  { %8 = vsyncpa [#allocation3], 0  ;;  %53 = vmatpush.bf16.msra.mxu0 %v97_v0  ;;  %v96_v1 = vld [vmem:[%s167_s1] sm:$0xff]  ;;  %vm43_vm0 = vcmask 261120   ;;  %vm61_vm1 = vcmask 130048   ;;  %s128_s20 = smov [#allocation2]  }
   0x3   :  { %v95_v2 = vld [vmem:[%s166_s0] sm:$0xff]  ;;  %s68_s21 = sshll.u32 %s128_s20, 4  ;;  %s70_s1 = sshll.u32 %s169_s3, 4  ;;  %s69_s21 = int_to_ptr.vmem [resolvable:$true] %s68_s21  ;;  %s71_s1 = int_to_ptr.hbm [resolvable:$true] %s70_s1 }
   0x4   :  { %v101_v3 = vld [vmem:[%s168_s2] ss:$0 sm:$0xff]  ;;  %s129_s0 = smov 128   ;;  %s130_s24 = smov 8  }
   0x6   :  { %54 = vmatpush.bf16.msra.mxu0 %v96_v1 }
   0x9   :  { %94 = vmatmul.msk.bf16.vlgmr.msra.gmra.mxu0 %vm43_vm0, %v95_v2 }
  0x86   :  { %v56_v4 = vpop.f32.mrf.mxu0 }
  0x87   :  { %v57_v5 = vadd.f32 %v101_v3, %v56_v4 }
  0x89   :  { %62 = vst.msk [vmem:[#allocation2] sm:$0xff] %vm61_vm1, %v57_v5 }
  0x8e   :  { %v58_v6 = vpop.f32.mrf.mxu0 }
  0x8f   :  { %v59_v7 = vadd.f32 %v101_v3, %v58_v6 }
  0x91   :  { %63 = vst.msk [vmem:[#allocation2 + $0x8] sm:$0xff] %vm61_vm1, %v59_v7 }
  0x92   :  { %76 = dma.vmem_to_hbm [thread:$0]  %s69_s21, 256, %s71_s1, [#allocation3], %s129_s0, %s129_s0, %s130_s24  }
  0x93   :  { %126 = dma.done.wait [#allocation3], 256  }
  0x94   :  { %127 = vsyncadd [#allocation3], 4294967040 }
  0x95   :  { %81 = vsyncpa [#allocation3], 1 }

</bundles_post_ra>
